<compile_context>
chip_gen: v7x
topology: tpu7x:2x2x1
jax: 0.10.0
libtpu: 0.0.40
codegen_flags: <defaults>
</compile_context>

<pallas_src>
import jax
import jax.numpy as jnp
from jax.experimental import pallas as pl
from jax.experimental.pallas import tpu as pltpu

NEG_SLOPE = 0.01  # torch.nn.functional.leaky_relu default


def _leaky_relu(x):
    return jnp.where(x > 0, x, NEG_SLOPE * x)


def _round_up(x, m):
    return (x + m - 1) // m * m


def critic_kernel(sa_ref,                 # (TB, S+A)     bf16  streamed
                  w_in_ref, b_in_ref,     # (S+A, H+H2)   bf16, (1, H+H2) f32
                  w_mid_ref, b_mid_ref,   # (H+H2, H)     bf16, (1, H)    f32
                  w3_ref, b3_ref,         # (H, H2)       bf16, (1, H2)   f32
                  w4_ref,                 # (1, H2)       f32  (row of linear2)
                  b4_ref,                 # (1, 1)        f32  in SMEM
                  out_ref):               # (TB, 1)       f32  streamed out
    xin = sa_ref[...]                                            # bf16 (TB, S+A)

    # Fused state1 + action1 (block-diagonal weight): [s1 | a1]
    h = _leaky_relu(
        jnp.dot(xin, w_in_ref[...], preferred_element_type=jnp.float32)
        + b_in_ref[...])                                         # f32 (TB, H+H2)

    # Fused state2 + identity pass-through of a1: [s2_pre | a1]
    m = (jnp.dot(h.astype(jnp.bfloat16), w_mid_ref[...],
                 preferred_element_type=jnp.float32)
         + b_mid_ref[...])                                       # f32 (TB, H)

    # leaky only on the s2 columns (first H2 lanes); a1 is already activated.
    h2 = w3_ref.shape[1]
    col = jax.lax.broadcasted_iota(jnp.int32, m.shape, 1)
    m = jnp.where(col < h2, _leaky_relu(m), m)

    # linear1 with the original (unsplit) W3.
    x = _leaky_relu(
        jnp.dot(m.astype(jnp.bfloat16), w3_ref[...],
                preferred_element_type=jnp.float32)
        + b3_ref[...])                                           # f32 (TB, H2)

    # linear2 (H2 -> 1) as a lane-reduce on the VPU/XLU instead of the MXU.
    out_ref[...] = (jnp.sum(x * w4_ref[...], axis=-1, keepdims=True)
                    + b4_ref[0, 0])


def critic_forward(state, action, params, *, block_b=8192, min_split_rows=1024):
    """state: (B, S) f32, action: (B, A) f32 -> (B, 1) f32.

    block_b: max batch rows per grid step (multiple-of-16 tile). The VMEM
    limiter is the lane-padded f32 intermediates (~TB*128*4 B each); 8192 fits
    on v5e/v6e/v7x with the raised vmem limit below. min_split_rows: above
    this batch size the grid is forced to >=2 steps so the "parallel" axis can
    use both TensorCores on v7x.
    """
    B, S = state.shape
    A = action.shape[1]

    # Single fused wrapper pass: concat + bf16 cast (+ pad only if needed).
    sa = jnp.concatenate([state, action], axis=-1).astype(jnp.bfloat16)

    SA = S + A
    Hp = params["w_in"].shape[1]    # H + H2
    Hm = params["w_mid"].shape[1]   # H
    H2 = params["w3"].shape[1]      # H // 2

    n_tiles = max(pl.cdiv(B, block_b), 2 if B >= min_split_rows else 1)
    TB = _round_up(pl.cdiv(B, n_tiles), 16)     # 16: bf16 sublane packing
    B_pad = _round_up(B, TB)
    grid = (B_pad // TB,)

    if B_pad != B:
        sa = jnp.pad(sa, ((0, B_pad - B), (0, 0)))

    flops = 2 * B_pad * (SA * Hp + Hp * Hm + Hm * H2 + H2)
    param_bytes = sum(int(p.size) * p.dtype.itemsize for p in params.values())
    bytes_accessed = int(sa.size) * 2 + param_bytes + B_pad * 4

    out = pl.pallas_call(
        critic_kernel,
        out_shape=jax.ShapeDtypeStruct((B_pad, 1), jnp.float32),
        grid=grid,
        in_specs=[
            # streamed per-tile input (single fused [state|action] stream)
            pl.BlockSpec((TB, SA), lambda i: (i, 0)),
            # weights / biases: constant block index -> DMA'd once, VMEM-resident
            pl.BlockSpec((SA, Hp), lambda i: (0, 0)),
            pl.BlockSpec((1, Hp), lambda i: (0, 0)),
            pl.BlockSpec((Hp, Hm), lambda i: (0, 0)),
            pl.BlockSpec((1, Hm), lambda i: (0, 0)),
            pl.BlockSpec((Hm, H2), lambda i: (0, 0)),
            pl.BlockSpec((1, H2), lambda i: (0, 0)),
            pl.BlockSpec((1, H2), lambda i: (0, 0)),
            # scalar last-layer bias in SMEM
            pl.BlockSpec(memory_space=pltpu.MemorySpace.SMEM),
        ],
        out_specs=pl.BlockSpec((TB, 1), lambda i: (i, 0)),
        compiler_params=pltpu.CompilerParams(
            dimension_semantics=("parallel",),
            vmem_limit_bytes=48 * 1024 * 1024),
        cost_estimate=pl.CostEstimate(
            flops=flops, transcendentals=0, bytes_accessed=bytes_accessed),
    )(sa,
      params["w_in"], params["b_in"],
      params["w_mid"], params["b_mid"],
      params["w3"], params["b3"],
      params["w4_row"], params["b4"])

    return out[:B]


def init_critic_params(key, state_size, hidden_size, action_size):
    """f32 params mimicking torch.nn.Linear default init, pre-transposed (in, out)."""
    h2 = hidden_size // 2

    def linear(key, fan_in, fan_out):
        kw, kb = jax.random.split(key)
        bound = 1.0 / jnp.sqrt(fan_in)
        w = jax.random.uniform(kw, (fan_in, fan_out), jnp.float32, -bound, bound)
        b = jax.random.uniform(kb, (1, fan_out), jnp.float32, -bound, bound)
        return w, b

    k1, k2, k3, k4, k5 = jax.random.split(key, 5)
    w1, b1 = linear(k1, state_size, hidden_size)    # state1
    w2, b2 = linear(k2, hidden_size, h2)            # state2
    wa, ba = linear(k3, action_size, h2)            # action1
    w3, b3 = linear(k4, hidden_size, h2)            # linear1
    w4, b4 = linear(k5, h2, 1)                      # linear2
    return {"w1": w1, "b1": b1, "w2": w2, "b2": b2, "wa": wa, "ba": ba,
            "w3": w3, "b3": b3, "w4": w4, "b4": b4}


def prepare_critic_params(raw):
    """Build the fused/bf16 kernel parameter set (done once, off the hot path)."""
    S, H = raw["w1"].shape
    A = raw["wa"].shape[0]
    H2 = raw["w2"].shape[1]
    bf = jnp.bfloat16

    # blockdiag(W1, Wa): [state | action] -> [s1 | a1]
    w_in = jnp.zeros((S + A, H + H2), jnp.float32)
    w_in = w_in.at[:S, :H].set(raw["w1"]).at[S:, H:].set(raw["wa"])
    b_in = jnp.concatenate([raw["b1"], raw["ba"]], axis=1)

    # blockdiag(W2, I_H2): [s1 | a1] -> [s2_pre | a1]
    w_mid = jnp.zeros((H + H2, 2 * H2), jnp.float32)
    w_mid = w_mid.at[:H, :H2].set(raw["w2"]).at[H:, H2:].set(jnp.eye(H2))
    b_mid = jnp.concatenate([raw["b2"], jnp.zeros((1, H2), jnp.float32)], axis=1)

    return {
        "w_in": w_in.astype(bf), "b_in": b_in,
        "w_mid": w_mid.astype(bf), "b_mid": b_mid,
        "w3": raw["w3"].astype(bf), "b3": raw["b3"],
        "w4_row": raw["w4"].T,          # (1, H2) f32, used on the VPU
        "b4": raw["b4"],                # (1, 1)  f32, SMEM
    }


def critic_reference(state, action, raw):
    """Pure-JAX reference mirroring the kernel's bf16 quantization points."""
    f32 = jnp.float32
    q = lambda x: x.astype(jnp.bfloat16).astype(f32)
    s1 = _leaky_relu(q(state) @ q(raw["w1"]) + raw["b1"])
    a1 = _leaky_relu(q(action) @ q(raw["wa"]) + raw["ba"])
    s2 = _leaky_relu(q(s1) @ q(raw["w2"]) + raw["b2"])
    x = jnp.concatenate([q(s2), q(a1)], axis=1)
    x = _leaky_relu(x @ q(raw["w3"]) + raw["b3"])
    return x @ raw["w4"] + raw["b4"]


if __name__ == "__main__":
    BATCH = 4
    STATE_SIZE = 16
    HIDDEN_SIZE = 32
    ACTION_SIZE = 8

    key = jax.random.PRNGKey(0)
    k_params, k_state, k_action = jax.random.split(key, 3)

    raw_params = init_critic_params(k_params, STATE_SIZE, HIDDEN_SIZE, ACTION_SIZE)
    params = prepare_critic_params(raw_params)

    state = jax.random.normal(k_state, (BATCH, STATE_SIZE), jnp.float32)
    action = jax.random.normal(k_action, (BATCH, ACTION_SIZE), jnp.float32)

    out = critic_forward(state, action, params)
    out = jax.block_until_ready(out)

    ref = critic_reference(state, action, raw_params)
    assert out.shape == (BATCH, 1), out.shape
    assert jnp.allclose(out, ref, atol=2e-3, rtol=2e-3), (out, ref)

    print("KERNEL_OK")
</pallas_src>

<mosaic_0001>
module attributes {stable_mosaic.version = 11 : i64} {
  func.func @critic_kernel(%arg0: i32, %arg1: memref<16x24xbf16, #tpu.memory_space<vmem>>, %arg2: memref<24x48xbf16, #tpu.memory_space<vmem>>, %arg3: memref<1x48xf32, #tpu.memory_space<vmem>>, %arg4: memref<48x32xbf16, #tpu.memory_space<vmem>>, %arg5: memref<1x32xf32, #tpu.memory_space<vmem>>, %arg6: memref<32x16xbf16, #tpu.memory_space<vmem>>, %arg7: memref<1x16xf32, #tpu.memory_space<vmem>>, %arg8: memref<1x16xf32, #tpu.memory_space<vmem>>, %arg9: memref<1x1xf32, #tpu.memory_space<smem>>, %arg10: memref<16x1xf32, #tpu.memory_space<vmem>>) attributes {dimension_semantics = [#tpu.dimension_semantics<parallel>], iteration_bounds = array<i64: 1>, scalar_prefetch = 0 : i64, scratch_operands = 0 : i64, tpu.core_type = #tpu.core_type<tc>, window_params = [{transform_indices = @transform_0, window_bounds = array<i64: 16, 24>}, {pipeline_mode = #tpu.pipeline_mode<synchronous>, transform_indices = @transform_1, window_bounds = array<i64: 24, 48>}, {pipeline_mode = #tpu.pipeline_mode<synchronous>, transform_indices = @transform_2, window_bounds = array<i64: 1, 48>}, {pipeline_mode = #tpu.pipeline_mode<synchronous>, transform_indices = @transform_3, window_bounds = array<i64: 48, 32>}, {pipeline_mode = #tpu.pipeline_mode<synchronous>, transform_indices = @transform_4, window_bounds = array<i64: 1, 32>}, {pipeline_mode = #tpu.pipeline_mode<synchronous>, transform_indices = @transform_5, window_bounds = array<i64: 32, 16>}, {pipeline_mode = #tpu.pipeline_mode<synchronous>, transform_indices = @transform_6, window_bounds = array<i64: 1, 16>}, {pipeline_mode = #tpu.pipeline_mode<synchronous>, transform_indices = @transform_7, window_bounds = array<i64: 1, 16>}, {transform_indices = @transform_8, window_bounds = array<i64: 1, 1>}, {transform_indices = @transform_9, window_bounds = array<i64: 16, 1>}]} {
    %c0 = arith.constant 0 : index
    %c0_0 = arith.constant 0 : index
    %0 = vector.load %arg1[%c0, %c0_0] : memref<16x24xbf16, #tpu.memory_space<vmem>>, vector<16x24xbf16>
    %c0_1 = arith.constant 0 : index
    %c0_2 = arith.constant 0 : index
    %1 = vector.load %arg2[%c0_1, %c0_2] : memref<24x48xbf16, #tpu.memory_space<vmem>>, vector<24x48xbf16>
    %cst = arith.constant dense<0.000000e+00> : vector<16x48xf32>
    %2 = tpu.matmul %0, %1, %cst {dimension_numbers = #tpu.dot_dimension_numbers<[1], [0], [0], [1], [0, 0, 1, 1], [], []>} : vector<16x24xbf16>, vector<24x48xbf16>, vector<16x48xf32> -> vector<16x48xf32>
    %c0_3 = arith.constant 0 : index
    %c0_4 = arith.constant 0 : index
    %3 = vector.load %arg3[%c0_3, %c0_4] : memref<1x48xf32, #tpu.memory_space<vmem>>, vector<1x48xf32>
    %4 = vector.broadcast %3 : vector<1x48xf32> to vector<16x48xf32>
    %5 = arith.addf %2, %4 : vector<16x48xf32>
    %cst_5 = arith.constant 0.000000e+00 : f32
    %6 = vector.broadcast %cst_5 : f32 to vector<16x48xf32>
    %7 = arith.cmpf ogt, %5, %6 : vector<16x48xf32>
    %cst_6 = arith.constant 0.00999999977 : f32
    %8 = vector.broadcast %cst_6 : f32 to vector<16x48xf32>
    %9 = arith.mulf %8, %5 : vector<16x48xf32>
    %10 = arith.select %7, %5, %9 : vector<16x48xi1>, vector<16x48xf32>
    %11 = arith.truncf %10 : vector<16x48xf32> to vector<16x48xbf16>
    %c0_7 = arith.constant 0 : index
    %c0_8 = arith.constant 0 : index
    %12 = vector.load %arg4[%c0_7, %c0_8] : memref<48x32xbf16, #tpu.memory_space<vmem>>, vector<48x32xbf16>
    %cst_9 = arith.constant dense<0.000000e+00> : vector<16x32xf32>
    %13 = tpu.matmul %11, %12, %cst_9 {dimension_numbers = #tpu.dot_dimension_numbers<[1], [0], [0], [1], [0, 0, 1, 1], [], []>} : vector<16x48xbf16>, vector<48x32xbf16>, vector<16x32xf32> -> vector<16x32xf32>
    %c0_10 = arith.constant 0 : index
    %c0_11 = arith.constant 0 : index
    %14 = vector.load %arg5[%c0_10, %c0_11] : memref<1x32xf32, #tpu.memory_space<vmem>>, vector<1x32xf32>
    %15 = vector.broadcast %14 : vector<1x32xf32> to vector<16x32xf32>
    %16 = arith.addf %13, %15 : vector<16x32xf32>
    %17 = tpu.iota {dimensions = array<i32: 1>} : vector<16x32xi32>
    %c16_i32 = arith.constant 16 : i32
    %18 = vector.broadcast %c16_i32 : i32 to vector<16x32xi32>
    %19 = arith.cmpi slt, %17, %18 : vector<16x32xi32>
    %cst_12 = arith.constant 0.000000e+00 : f32
    %20 = vector.broadcast %cst_12 : f32 to vector<16x32xf32>
    %21 = arith.cmpf ogt, %16, %20 : vector<16x32xf32>
    %cst_13 = arith.constant 0.00999999977 : f32
    %22 = vector.broadcast %cst_13 : f32 to vector<16x32xf32>
    %23 = arith.mulf %22, %16 : vector<16x32xf32>
    %24 = arith.select %21, %16, %23 : vector<16x32xi1>, vector<16x32xf32>
    %25 = arith.select %19, %24, %16 : vector<16x32xi1>, vector<16x32xf32>
    %26 = arith.truncf %25 : vector<16x32xf32> to vector<16x32xbf16>
    %c0_14 = arith.constant 0 : index
    %c0_15 = arith.constant 0 : index
    %27 = vector.load %arg6[%c0_14, %c0_15] : memref<32x16xbf16, #tpu.memory_space<vmem>>, vector<32x16xbf16>
    %cst_16 = arith.constant dense<0.000000e+00> : vector<16x16xf32>
    %28 = tpu.matmul %26, %27, %cst_16 {dimension_numbers = #tpu.dot_dimension_numbers<[1], [0], [0], [1], [0, 0, 1, 1], [], []>} : vector<16x32xbf16>, vector<32x16xbf16>, vector<16x16xf32> -> vector<16x16xf32>
    %c0_17 = arith.constant 0 : index
    %c0_18 = arith.constant 0 : index
    %29 = vector.load %arg7[%c0_17, %c0_18] : memref<1x16xf32, #tpu.memory_space<vmem>>, vector<1x16xf32>
    %30 = vector.broadcast %29 : vector<1x16xf32> to vector<16x16xf32>
    %31 = arith.addf %28, %30 : vector<16x16xf32>
    %cst_19 = arith.constant 0.000000e+00 : f32
    %32 = vector.broadcast %cst_19 : f32 to vector<16x16xf32>
    %33 = arith.cmpf ogt, %31, %32 : vector<16x16xf32>
    %cst_20 = arith.constant 0.00999999977 : f32
    %34 = vector.broadcast %cst_20 : f32 to vector<16x16xf32>
    %35 = arith.mulf %34, %31 : vector<16x16xf32>
    %36 = arith.select %33, %31, %35 : vector<16x16xi1>, vector<16x16xf32>
    %c0_21 = arith.constant 0 : index
    %c0_22 = arith.constant 0 : index
    %37 = vector.load %arg8[%c0_21, %c0_22] : memref<1x16xf32, #tpu.memory_space<vmem>>, vector<1x16xf32>
    %38 = vector.broadcast %37 : vector<1x16xf32> to vector<16x16xf32>
    %39 = arith.mulf %36, %38 : vector<16x16xf32>
    %cst_23 = arith.constant dense<0.000000e+00> : vector<16xf32>
    %40 = vector.multi_reduction <add>, %39, %cst_23 [1] : vector<16x16xf32> to vector<16xf32>
    %41 = vector.shape_cast %40 : vector<16xf32> to vector<16x1xf32>
    %c0_24 = arith.constant 0 : index
    %c0_25 = arith.constant 0 : index
    %42 = memref.load %arg9[%c0_24, %c0_25] : memref<1x1xf32, #tpu.memory_space<smem>>
    %43 = vector.broadcast %42 : f32 to vector<16x1xf32>
    %44 = arith.addf %41, %43 : vector<16x1xf32>
    %c0_26 = arith.constant 0 : index
    %c0_27 = arith.constant 0 : index
    %45 = vector.load %arg10[%c0_26, %c0_27] : memref<16x1xf32, #tpu.memory_space<vmem>>, vector<16x1xf32>
    tpu.vector_store %arg10[%c0_26, %c0_27], %44 {strides = array<i32>} : memref<16x1xf32, #tpu.memory_space<vmem>>, vector<16x1xf32>,
    return
  }
  func.func @transform_0(%arg0: i32) -> (i32, i32) {
    %c0_i32 = arith.constant 0 : i32
    %c0_i32_0 = arith.constant 0 : i32
    return %arg0, %c0_i32 : i32, i32
  }
  func.func @transform_1(%arg0: i32) -> (i32, i32) {
    %c0_i32 = arith.constant 0 : i32
    %c0_i32_0 = arith.constant 0 : i32
    %c0_i32_1 = arith.constant 0 : i32
    return %c0_i32, %c0_i32_0 : i32, i32
  }
  func.func @transform_2(%arg0: i32) -> (i32, i32) {
    %c0_i32 = arith.constant 0 : i32
    %c0_i32_0 = arith.constant 0 : i32
    %c0_i32_1 = arith.constant 0 : i32
    return %c0_i32, %c0_i32_0 : i32, i32
  }
  func.func @transform_3(%arg0: i32) -> (i32, i32) {
    %c0_i32 = arith.constant 0 : i32
    %c0_i32_0 = arith.constant 0 : i32
    %c0_i32_1 = arith.constant 0 : i32
    return %c0_i32, %c0_i32_0 : i32, i32
  }
  func.func @transform_4(%arg0: i32) -> (i32, i32) {
    %c0_i32 = arith.constant 0 : i32
    %c0_i32_0 = arith.constant 0 : i32
    %c0_i32_1 = arith.constant 0 : i32
    return %c0_i32, %c0_i32_0 : i32, i32
  }
  func.func @transform_5(%arg0: i32) -> (i32, i32) {
    %c0_i32 = arith.constant 0 : i32
    %c0_i32_0 = arith.constant 0 : i32
    %c0_i32_1 = arith.constant 0 : i32
    return %c0_i32, %c0_i32_0 : i32, i32
  }
  func.func @transform_6(%arg0: i32) -> (i32, i32) {
    %c0_i32 = arith.constant 0 : i32
    %c0_i32_0 = arith.constant 0 : i32
    %c0_i32_1 = arith.constant 0 : i32
    return %c0_i32, %c0_i32_0 : i32, i32
  }
  func.func @transform_7(%arg0: i32) -> (i32, i32) {
    %c0_i32 = arith.constant 0 : i32
    %c0_i32_0 = arith.constant 0 : i32
    %c0_i32_1 = arith.constant 0 : i32
    return %c0_i32, %c0_i32_0 : i32, i32
  }
  func.func @transform_8(%arg0: i32) -> (i32, i32) {
    %c0_i32 = arith.constant 0 : i32
    %c0_i32_0 = arith.constant 0 : i32
    %c0_i32_1 = arith.constant 0 : i32
    return %c0_i32, %c0_i32_0 : i32, i32
  }
  func.func @transform_9(%arg0: i32) -> (i32, i32) {
    %c0_i32 = arith.constant 0 : i32
    %c0_i32_0 = arith.constant 0 : i32
    return %arg0, %c0_i32 : i32, i32
  }
}

</mosaic_0001>

<bundles_post_ra>
// kernel: tpu_custom_call.1
= control target key start
LH: loop header
LB: loop body
LE: loop exit
PB: predicated region body
PF: predicated region fallthrough
CT: control target
= control target key end

     0   :  { %v366_v0 = vmov 0.0   ;;  %vm64_vm0 = vcmask 1043456   ;;  %vm367_vm1 = vmmov 0   ;;  %vm60_vm2 = vcmask 195584   ;;  %s466_s1 = inlined_call_operand.vmem [shape: bf16[24,48], index: 1, kind: input, shape index: {}]   ;;  %s467_s0 = inlined_call_operand.vmem [shape: bf16[16,24], index: 0, kind: input, shape index: {}]   ;;  %s468_s3 = inlined_call_operand.vmem [shape: bf16[48,32], index: 3, kind: input, shape index: {}]   ;;  %s469_s2 = inlined_call_operand.vmem [shape: f32[1,48], index: 2, kind: input, shape index: {}]   ;;  %s470_s5 = inlined_call_operand.vmem [shape: bf16[32,16], index: 5, kind: input, shape index: {}]   ;;  %s471_s4 = inlined_call_operand.vmem [shape: f32[1,32], index: 4, kind: input, shape index: {}]   ;;  %s472_s6 = inlined_call_operand.vmem [shape: f32[1,16], index: 6, kind: input, shape index: {}]   ;;  %s473_s7 = inlined_call_operand.vmem [shape: f32[1,16], index: 7, kind: input, shape index: {}]   ;;  %s474_s8 = inlined_call_operand.<no memory space> [shape: f32[1,1], index: 8, kind: input, shape index: {}]   ;;  %s475_s9 = inlined_call_operand.vmem [shape: f32[16,1], index: 9, kind: output, shape index: {}]  }
   0x1   :  { %330 = vmatprep.subr.bf16.mxu0 %v366_v0  ;;  %v358_v1 = vld [vmem:[%s466_s1] sm:$0xff]   ;;  %334 = vmatprep.mubr.msk.bf16.mxu0 %vm367_vm1, %v366_v0  ;;  %v359_v2 = vld [vmem:[%s466_s1 + $0x8] ss:$0 sps:$4 sm:$0xff]   ;;  %v363_v7 = vld [vmem:[%s468_s3 + $0x10] sm:$0xff]   ;;  %vm147_vm5 = vcmask 392192   ;;  %v192_v22 = vlaneseq  ;;  %vm227_vm9 = vcmask 261120   ;;  %v295_v54 = vstv %s474_s8 }
   0x2   :  { %338 = vmatprep.subr.bf16.mxu1 %v366_v0  ;;  %344 = vmatprep.mubr.msk.bf16.mxu1 %vm367_vm1, %v366_v0  ;;  %v66_v3 = vsel %vm64_vm0, %v359_v2, 0  ;;  %v361_v4 = vld [vmem:[%s468_s3] sm:$0xff]   ;;  %v362_v6 = vld [vmem:[%s468_s3 + $0x8] sm:$0xff]   ;;  %vm287_vm12 = vcmask 130048   ;;  %vm298_vm13 = vcmask 7168  }
   0x3   :  { %331 = vmatpush3.bf16.msra.mxu0 %v358_v1  ;;  %v360_v5 = vld [vmem:[%s467_s0] sm:$0xff]   ;;  %339 = vmatpush3.bf16.msra.mxu1 %v361_v4  ;;  %v365_v21 = vld [vmem:[%s470_s5 + $0x8] sm:$0xff]   ;;  %v193_v26 = vand.u32 127, %v192_v22 }
   0x4   :  { %332 = vmatprep.subr.bf16.mxu0 %v366_v0  ;;  %340 = vmatprep.subr.bf16.mxu1 %v366_v0  ;;  %v305_v8 = vld [vmem:[%s469_s2] ss:$0 sm:$0xff] }
   0x5   :  { %v364_v20 = vld [vmem:[%s470_s5] sm:$0xff]   ;;  %vm194_vm7 = vcmp.lt.s32.totalorder %v193_v26, 16 }
   0x6   :  { %v310_v23 = vld [vmem:[%s471_s4] ss:$0 sm:$0xff] }
   0x7   :  { %333 = vmatpush3.bf16.msra.mxu0 %v66_v3  ;;  %341 = vmatpush3.bf16.msra.mxu1 %v362_v6  ;;  %v315_v38 = vld [vmem:[%s472_s6] ss:$0 sm:$0xff] }
   0x8   :  { %348 = vmatprep.subr.bf16.mxu0 %v366_v0  ;;  %342 = vmatprep.subr.bf16.mxu1 %v366_v0  ;;  %v319_v46 = vld [vmem:[%s473_s7] ss:$0 sm:$0xff] }
   0xa   :  { %335 = vmatmul.mubr.msk.bf16.vlgmr.msra.gmra.mrb[0].mxu0 %vm60_vm2, %v360_v5 }
   0xb   :  { %352 = vmatprep.mubr.msk.bf16.mxu0 %vm367_vm1, %v366_v0  ;;  %343 = vmatpush3.bf16.msra.mxu1 %v363_v7 }
   0xc   :  { %349 = vmatpush3.bf16.msra.mxu0 %v364_v20 }
   0xd   :  { %350 = vmatprep.subr.bf16.mxu0 %v366_v0 }
  0x10   :  { %351 = vmatpush3.bf16.msra.mxu0 %v365_v21 }
  0xdd   :  { %v102_v9 = vpop.f32.mrb[0].mxu0 }
  0xde   :  { %v103_v10 = vadd.f32 %v305_v8, %v102_v9  ;;  %v336_v11 = vpop.f32.mrb[1].mxu0 }
  0xdf   :  { %v105_v12 = vpop.f32.mrb[2].mxu0 }
  0xe0   :  { %v111_v13 = vmul.f32 0.01, %v103_v10  ;;  %v106_v14 = vadd.f32 %v305_v8, %v105_v12  ;;  %v337_v15 = vpop.f32.mrb[3].mxu0  ;;  %vm109_vm3 = vcmp.gt.f32.partialorder %v103_v10, 0.0 }
  0xe2   :  { %vm110_vm4 = vcmp.gt.f32.partialorder %v106_v14, 0.0  ;;  %v112_v16 = vmul.f32 0.01, %v106_v14  ;;  %v113_v17 = vsel %vm109_vm3, %v103_v10, %v111_v13 }
  0xe4   :  { %v114_v18 = vsel %vm110_vm4, %v106_v14, %v112_v16 }
  0xe5   :  { %v115_v19 = vpack.c.bf16 %v114_v18, %v113_v17 }
  0xe7   :  { %345 = vmatmul.mubr.msk.bf16.vlgmr.msra.gmra.mrb[0].mxu1 %vm147_vm5, %v115_v19 }
 0x1ba   :  { %v185_v24 = vpop.f32.mrb[0].mxu1 }
 0x1bb   :  { %v186_v25 = vadd.f32 %v310_v23, %v185_v24  ;;  %v346_v27 = vpop.f32.mrb[1].mxu1 }
 0x1bc   :  { %v188_v28 = vpop.f32.mrb[2].mxu1 }
 0x1bd   :  { %vm195_vm6 = vcmp.gt.f32.partialorder %v186_v25, 0.0  ;;  %v197_v29 = vmul.f32 0.01, %v186_v25  ;;  %v189_v30 = vadd.f32 %v310_v23, %v188_v28  ;;  %v347_v31 = vpop.f32.mrb[3].mxu1 }
 0x1bf   :  { %v199_v32 = vsel %vm195_vm6, %v186_v25, %v197_v29  ;;  %vm196_vm8 = vcmp.gt.f32.partialorder %v189_v30, 0.0  ;;  %v198_v33 = vmul.f32 0.01, %v189_v30 }
 0x1c0   :  { %v201_v35 = vsel %vm194_vm7, %v199_v32, %v186_v25 }
 0x1c1   :  { %v200_v34 = vsel %vm196_vm8, %v189_v30, %v198_v33 }
 0x1c2   :  { %v202_v36 = vsel %vm194_vm7, %v200_v34, %v189_v30 }
 0x1c3   :  { %v203_v37 = vpack.c.bf16 %v202_v36, %v201_v35 }
 0x1c5   :  { %353 = vmatmul.mubr.msk.bf16.vlgmr.msra.gmra.mrb[4].mxu0 %vm227_vm9, %v203_v37 }
 0x298   :  { %v265_v39 = vpop.f32.mrb[4].mxu0 }
 0x299   :  { %v266_v40 = vadd.f32 %v315_v38, %v265_v39  ;;  %v354_v41 = vpop.f32.mrb[5].mxu0 }
 0x29a   :  { %v268_v42 = vpop.f32.mrb[6].mxu0 }
 0x29b   :  { %v274_v43 = vmul.f32 0.01, %v266_v40  ;;  %v269_v44 = vadd.f32 %v315_v38, %v268_v42  ;;  %v355_v45 = vpop.f32.mrb[7].mxu0  ;;  %vm272_vm10 = vcmp.gt.f32.partialorder %v266_v40, 0.0 }
 0x29d   :  { %vm273_vm11 = vcmp.gt.f32.partialorder %v269_v44, 0.0  ;;  %v275_v47 = vmul.f32 0.01, %v269_v44  ;;  %v276_v48 = vsel %vm272_vm10, %v266_v40, %v274_v43 }
 0x29e   :  { %v285_v49 = vmul.f32 %v319_v46, %v276_v48 }
 0x29f   :  { %v277_v50 = vsel %vm273_vm11, %v269_v44, %v275_v47 }
 0x2a0   :  { %v288_v51 = vsel %vm287_vm12, %v285_v49, 0.0  ;;  %v286_v52 = vmul.f32 %v319_v46, %v277_v50 }
 0x2a1   :  { %289 = vadd.xlane.f32.xlu0 %v288_v51 }
 0x2a2   :  { %v291_v53 = vsel %vm287_vm12, %v286_v52, 0.0 }
 0x2a5   :  { %292 = vadd.xlane.f32.xlu0 %v291_v53 }
 0x32e   :  { %v290_v55 = vpop.xlane.xlu0 %289 }
 0x32f   :  { %v296_v56 = vadd.f32 %v295_v54, %v290_v55 }
 0x331   :  { %299 = vst.msk [vmem:[%s475_s9] sm:$0xff] %vm298_vm13, %v296_v56 }
 0x332   :  { %v293_v57 = vpop.xlane.xlu0 %292 }
 0x333   :  { %v297_v58 = vadd.f32 %v295_v54, %v293_v57 }
 0x335   :  { %300 = vst.msk [vmem:[%s475_s9 + $0x8] sm:$0xff] %vm298_vm13, %v297_v58 }

</bundles_post_ra>
